<compile_context>
chip_gen: v5e
topology: v5e:2x2
jax: 0.10.0
libtpu: 0.0.40
codegen_flags: <defaults>
</compile_context>

<pallas_src>
import functools

import jax
import jax.numpy as jnp
from jax.experimental import pallas as pl
from jax.experimental.pallas import tpu as pltpu


# --------------------------------- kernel -----------------------------------

def _mlp_kernel(x_ref, slab_ref, o_ref, *, mm_dtype):
    """One batch tile: (TILE_B, 4) -> (TILE_B, 2) class probabilities."""
    x = x_ref[...]                                   # (TILE_B, 4) f32

    # Static, offset-0 views into the packed parameter slab (no extra DMAs).
    w1 = slab_ref[0, 0:4, :]                         # (4, 16)
    w2 = slab_ref[1]                                 # (16, 16)
    w3 = slab_ref[2]                                 # (16, 16)
    w4 = slab_ref[3]                                 # (16, 16)
    w5 = slab_ref[4, :, 0:2]                         # (16, 2)
    b1 = slab_ref[5, 0:1, :]                         # (1, 16)
    b2 = slab_ref[6, 0:1, :]
    b3 = slab_ref[7, 0:1, :]
    b4 = slab_ref[8, 0:1, :]
    b5 = slab_ref[9, 0:1, 0:2]                       # (1, 2)

    def dense(h, w, b):
        return jnp.dot(h.astype(mm_dtype), w.astype(mm_dtype),
                       preferred_element_type=jnp.float32) + b

    h = jnp.maximum(dense(x, w1, b1), 0.0)
    h = jnp.maximum(dense(h, w2, b2), 0.0)
    h = jnp.maximum(dense(h, w3, b3), 0.0)
    h = jnp.maximum(dense(h, w4, b4), 0.0)
    logits = dense(h, w5, b5)                        # (TILE_B, 2)

    # 2-class softmax == sigmoid identity:
    #   p_i = sigmoid(l_i - l_other) = sigmoid(2*l_i - (l0 + l1)).
    # Numerically stable without the max-shift; one exp + one approx recip.
    s = jnp.sum(logits, axis=-1, keepdims=True)      # l0 + l1
    z = 2.0 * logits - s
    probs = pl.reciprocal(1.0 + jnp.exp(-z), approx=True)
    o_ref[...] = probs.astype(o_ref.dtype)


# -------------------------------- wrapper -----------------------------------

def _round_up(n, m):
    return ((n + m - 1) // m) * m


def pack_params(params):
    """Pack (w1, b1, ..., w5, b5) into one (10, 16, 16) f32 slab.

    Weights are stored as (in_features, out_features), i.e. the transpose of
    PyTorch's nn.Linear.weight; biases are 1-D (out_features,).
    Plane layout: 0..4 = W1..W5 (zero padded), 5..9 = b1..b5 in row 0.
    """
    w1, b1, w2, b2, w3, b3, w4, b4, w5, b5 = params
    slab = jnp.zeros((10, 16, 16), jnp.float32)
    slab = slab.at[0, :4, :].set(w1.astype(jnp.float32))
    slab = slab.at[1].set(w2.astype(jnp.float32))
    slab = slab.at[2].set(w3.astype(jnp.float32))
    slab = slab.at[3].set(w4.astype(jnp.float32))
    slab = slab.at[4, :, :2].set(w5.astype(jnp.float32))
    slab = slab.at[5, 0, :].set(b1.astype(jnp.float32))
    slab = slab.at[6, 0, :].set(b2.astype(jnp.float32))
    slab = slab.at[7, 0, :].set(b3.astype(jnp.float32))
    slab = slab.at[8, 0, :].set(b4.astype(jnp.float32))
    slab = slab.at[9, 0, :2].set(b5.astype(jnp.float32))
    return slab


def mlp_forward(x, slab, *, tile_b=256, use_bf16_matmul=False):
    """x: (B, 4) float32.  slab: packed parameters from pack_params()."""
    B = x.shape[0]
    x = x.astype(jnp.float32)

    # Batch tile: multiple of 8 sublanes; pad B so the grid divides evenly.
    tb = _round_up(min(tile_b, _round_up(B, 8)), 8)
    Bp = _round_up(B, tb)
    if Bp != B:
        x = jnp.pad(x, ((0, Bp - B), (0, 0)))

    mm_dtype = jnp.bfloat16 if use_bf16_matmul else jnp.float32

    # Advisory cost: 5 dense layers + the exp of the sigmoid.
    flops = 2 * (4 * 16 + 3 * 16 * 16 + 16 * 2) * Bp
    transcendentals = 2 * Bp
    bytes_accessed = 4 * (Bp * 4 + Bp * 2 + 10 * 16 * 16)

    # VMEM note (v7x has 64 MiB / 32 MiB scoped default): the per-step footprint
    # is 2*tb*4*4 B (double-buffered x) + 2*tb*2*4 B (out) + ~80 KiB resident
    # slab, so even very large tile_b fits comfortably on v5e/v6e/v7x.
    out = pl.pallas_call(
        functools.partial(_mlp_kernel, mm_dtype=mm_dtype),
        out_shape=jax.ShapeDtypeStruct((Bp, 2), jnp.float32),
        grid=(Bp // tb,),
        in_specs=[
            pl.BlockSpec((tb, 4), lambda i: (i, 0)),          # batch tile
            pl.BlockSpec((10, 16, 16), lambda i: (0, 0, 0)),  # resident params
        ],
        out_specs=pl.BlockSpec((tb, 2), lambda i: (i, 0)),
        compiler_params=pltpu.CompilerParams(
            dimension_semantics=("parallel",)),  # shards batch tiles across TCs on v7x
        cost_estimate=pl.CostEstimate(
            flops=flops,
            transcendentals=transcendentals,
            bytes_accessed=bytes_accessed),
    )(x, slab)
    return out[:B]


# ----------------------- init & pure-JAX reference --------------------------

def init_params(key):
    """PyTorch-equivalent nn.Linear init: U(-1/sqrt(fan_in), +1/sqrt(fan_in)).

    Weights are stored transposed as (in, out) for the kernel's x @ W layout."""
    dims = [(4, 16), (16, 16), (16, 16), (16, 16), (16, 2)]
    params = []
    for fan_in, fan_out in dims:
        key, kw, kb = jax.random.split(key, 3)
        bound = 1.0 / float(fan_in) ** 0.5
        w = jax.random.uniform(kw, (fan_in, fan_out), jnp.float32,
                               minval=-bound, maxval=bound)
        b = jax.random.uniform(kb, (fan_out,), jnp.float32,
                               minval=-bound, maxval=bound)
        params += [w, b]
    return tuple(params)


def mlp_reference(x, params):
    w1, b1, w2, b2, w3, b3, w4, b4, w5, b5 = params
    h = jax.nn.relu(x @ w1 + b1)
    h = jax.nn.relu(h @ w2 + b2)
    h = jax.nn.relu(h @ w3 + b3)
    h = jax.nn.relu(h @ w4 + b4)
    return jax.nn.softmax(h @ w5 + b5, axis=-1)


if __name__ == "__main__":
    key = jax.random.PRNGKey(0)
    key, kx = jax.random.split(key)

    B = 8
    x = jax.random.normal(kx, (B, 4), jnp.float32)
    params = init_params(key)
    slab = pack_params(params)

    out = mlp_forward(x, slab)
    out = jax.block_until_ready(out)

    assert out.shape == (B, 2)
    # Probabilities sum to 1 (relaxed tolerance for the EUP approx reciprocal).
    assert jnp.allclose(jnp.sum(out, axis=-1), 1.0, atol=5e-3)
    # Match the pure-JAX softmax reference.
    ref = mlp_reference(x, params)
    assert jnp.allclose(out, ref, atol=5e-3), jnp.max(jnp.abs(out - ref))

    print("KERNEL_OK")
</pallas_src>

<mosaic_0001>
module attributes {stable_mosaic.version = 11 : i64} {
  func.func @_mlp_kernel(%arg0: i32, %arg1: memref<8x4xf32, #tpu.memory_space<vmem>>, %arg2: memref<10x16x16xf32, #tpu.memory_space<vmem>>, %arg3: memref<8x2xf32, #tpu.memory_space<vmem>>) attributes {dimension_semantics = [#tpu.dimension_semantics<parallel>], iteration_bounds = array<i64: 1>, scalar_prefetch = 0 : i64, scratch_operands = 0 : i64, tpu.core_type = #tpu.core_type<tc>, window_params = [{transform_indices = @transform_0, window_bounds = array<i64: 8, 4>}, {pipeline_mode = #tpu.pipeline_mode<synchronous>, transform_indices = @transform_1, window_bounds = array<i64: 10, 16, 16>}, {transform_indices = @transform_2, window_bounds = array<i64: 8, 2>}]} {
    %c0 = arith.constant 0 : index
    %c0_0 = arith.constant 0 : index
    %0 = vector.load %arg1[%c0, %c0_0] : memref<8x4xf32, #tpu.memory_space<vmem>>, vector<8x4xf32>
    %c0_1 = arith.constant 0 : index
    %c0_2 = arith.constant 0 : index
    %c0_3 = arith.constant 0 : index
    %1 = vector.load %arg2[%c0_1, %c0_2, %c0_3] : memref<10x16x16xf32, #tpu.memory_space<vmem>>, vector<1x4x16xf32>
    %2 = vector.shape_cast %1 : vector<1x4x16xf32> to vector<4x16xf32>
    %c1 = arith.constant 1 : index
    %c0_4 = arith.constant 0 : index
    %c0_5 = arith.constant 0 : index
    %3 = vector.load %arg2[%c1, %c0_4, %c0_5] : memref<10x16x16xf32, #tpu.memory_space<vmem>>, vector<1x16x16xf32>
    %4 = vector.shape_cast %3 : vector<1x16x16xf32> to vector<16x16xf32>
    %c2 = arith.constant 2 : index
    %c0_6 = arith.constant 0 : index
    %c0_7 = arith.constant 0 : index
    %5 = vector.load %arg2[%c2, %c0_6, %c0_7] : memref<10x16x16xf32, #tpu.memory_space<vmem>>, vector<1x16x16xf32>
    %6 = vector.shape_cast %5 : vector<1x16x16xf32> to vector<16x16xf32>
    %c3 = arith.constant 3 : index
    %c0_8 = arith.constant 0 : index
    %c0_9 = arith.constant 0 : index
    %7 = vector.load %arg2[%c3, %c0_8, %c0_9] : memref<10x16x16xf32, #tpu.memory_space<vmem>>, vector<1x16x16xf32>
    %8 = vector.shape_cast %7 : vector<1x16x16xf32> to vector<16x16xf32>
    %c4 = arith.constant 4 : index
    %c0_10 = arith.constant 0 : index
    %c0_11 = arith.constant 0 : index
    %9 = vector.load %arg2[%c4, %c0_10, %c0_11] : memref<10x16x16xf32, #tpu.memory_space<vmem>>, vector<1x16x2xf32>
    %10 = vector.shape_cast %9 : vector<1x16x2xf32> to vector<16x2xf32>
    %c5 = arith.constant 5 : index
    %c0_12 = arith.constant 0 : index
    %c0_13 = arith.constant 0 : index
    %11 = vector.load %arg2[%c5, %c0_12, %c0_13] : memref<10x16x16xf32, #tpu.memory_space<vmem>>, vector<1x1x16xf32>
    %12 = vector.shape_cast %11 : vector<1x1x16xf32> to vector<1x16xf32>
    %c6 = arith.constant 6 : index
    %c0_14 = arith.constant 0 : index
    %c0_15 = arith.constant 0 : index
    %13 = vector.load %arg2[%c6, %c0_14, %c0_15] : memref<10x16x16xf32, #tpu.memory_space<vmem>>, vector<1x1x16xf32>
    %14 = vector.shape_cast %13 : vector<1x1x16xf32> to vector<1x16xf32>
    %c7 = arith.constant 7 : index
    %c0_16 = arith.constant 0 : index
    %c0_17 = arith.constant 0 : index
    %15 = vector.load %arg2[%c7, %c0_16, %c0_17] : memref<10x16x16xf32, #tpu.memory_space<vmem>>, vector<1x1x16xf32>
    %16 = vector.shape_cast %15 : vector<1x1x16xf32> to vector<1x16xf32>
    %c8 = arith.constant 8 : index
    %c0_18 = arith.constant 0 : index
    %c0_19 = arith.constant 0 : index
    %17 = vector.load %arg2[%c8, %c0_18, %c0_19] : memref<10x16x16xf32, #tpu.memory_space<vmem>>, vector<1x1x16xf32>
    %18 = vector.shape_cast %17 : vector<1x1x16xf32> to vector<1x16xf32>
    %c9 = arith.constant 9 : index
    %c0_20 = arith.constant 0 : index
    %c0_21 = arith.constant 0 : index
    %19 = vector.load %arg2[%c9, %c0_20, %c0_21] : memref<10x16x16xf32, #tpu.memory_space<vmem>>, vector<1x1x2xf32>
    %20 = vector.shape_cast %19 : vector<1x1x2xf32> to vector<1x2xf32>
    %cst = arith.constant dense<0.000000e+00> : vector<8x16xf32>
    %21 = tpu.matmul %0, %2, %cst {dimension_numbers = #tpu.dot_dimension_numbers<[1], [0], [0], [1], [0, 0, 1, 1], [], []>} : vector<8x4xf32>, vector<4x16xf32>, vector<8x16xf32> -> vector<8x16xf32>
    %22 = vector.broadcast %12 : vector<1x16xf32> to vector<8x16xf32>
    %23 = arith.addf %21, %22 : vector<8x16xf32>
    %cst_22 = arith.constant 0.000000e+00 : f32
    %24 = vector.broadcast %cst_22 : f32 to vector<8x16xf32>
    %25 = arith.maximumf %23, %24 : vector<8x16xf32>
    %cst_23 = arith.constant dense<0.000000e+00> : vector<8x16xf32>
    %26 = tpu.matmul %25, %4, %cst_23 {dimension_numbers = #tpu.dot_dimension_numbers<[1], [0], [0], [1], [0, 0, 1, 1], [], []>} : vector<8x16xf32>, vector<16x16xf32>, vector<8x16xf32> -> vector<8x16xf32>
    %27 = vector.broadcast %14 : vector<1x16xf32> to vector<8x16xf32>
    %28 = arith.addf %26, %27 : vector<8x16xf32>
    %cst_24 = arith.constant 0.000000e+00 : f32
    %29 = vector.broadcast %cst_24 : f32 to vector<8x16xf32>
    %30 = arith.maximumf %28, %29 : vector<8x16xf32>
    %cst_25 = arith.constant dense<0.000000e+00> : vector<8x16xf32>
    %31 = tpu.matmul %30, %6, %cst_25 {dimension_numbers = #tpu.dot_dimension_numbers<[1], [0], [0], [1], [0, 0, 1, 1], [], []>} : vector<8x16xf32>, vector<16x16xf32>, vector<8x16xf32> -> vector<8x16xf32>
    %32 = vector.broadcast %16 : vector<1x16xf32> to vector<8x16xf32>
    %33 = arith.addf %31, %32 : vector<8x16xf32>
    %cst_26 = arith.constant 0.000000e+00 : f32
    %34 = vector.broadcast %cst_26 : f32 to vector<8x16xf32>
    %35 = arith.maximumf %33, %34 : vector<8x16xf32>
    %cst_27 = arith.constant dense<0.000000e+00> : vector<8x16xf32>
    %36 = tpu.matmul %35, %8, %cst_27 {dimension_numbers = #tpu.dot_dimension_numbers<[1], [0], [0], [1], [0, 0, 1, 1], [], []>} : vector<8x16xf32>, vector<16x16xf32>, vector<8x16xf32> -> vector<8x16xf32>
    %37 = vector.broadcast %18 : vector<1x16xf32> to vector<8x16xf32>
    %38 = arith.addf %36, %37 : vector<8x16xf32>
    %cst_28 = arith.constant 0.000000e+00 : f32
    %39 = vector.broadcast %cst_28 : f32 to vector<8x16xf32>
    %40 = arith.maximumf %38, %39 : vector<8x16xf32>
    %cst_29 = arith.constant dense<0.000000e+00> : vector<8x2xf32>
    %41 = tpu.matmul %40, %10, %cst_29 {dimension_numbers = #tpu.dot_dimension_numbers<[1], [0], [0], [1], [0, 0, 1, 1], [], []>} : vector<8x16xf32>, vector<16x2xf32>, vector<8x2xf32> -> vector<8x2xf32>
    %42 = vector.broadcast %20 : vector<1x2xf32> to vector<8x2xf32>
    %43 = arith.addf %41, %42 : vector<8x2xf32>
    %cst_30 = arith.constant dense<0.000000e+00> : vector<8xf32>
    %44 = vector.multi_reduction <add>, %43, %cst_30 [1] : vector<8x2xf32> to vector<8xf32>
    %45 = vector.shape_cast %44 : vector<8xf32> to vector<8x1xf32>
    %cst_31 = arith.constant 2.000000e+00 : f32
    %46 = vector.broadcast %cst_31 : f32 to vector<8x2xf32>
    %47 = arith.mulf %46, %43 : vector<8x2xf32>
    %48 = vector.broadcast %45 : vector<8x1xf32> to vector<8x2xf32>
    %49 = arith.subf %47, %48 : vector<8x2xf32>
    %cst_32 = arith.constant 0.000000e+00 : f32
    %50 = vector.broadcast %cst_32 : f32 to vector<8x2xf32>
    %51 = arith.subf %50, %49 : vector<8x2xf32>
    %52 = math.exp %51 : vector<8x2xf32>
    %cst_33 = arith.constant 1.000000e+00 : f32
    %53 = vector.broadcast %cst_33 : f32 to vector<8x2xf32>
    %54 = arith.addf %53, %52 : vector<8x2xf32>
    %55 = tpu.reciprocal %54 {approx = true} : vector<8x2xf32> -> vector<8x2xf32>
    %c0_34 = arith.constant 0 : index
    %c0_35 = arith.constant 0 : index
    %56 = vector.load %arg3[%c0_34, %c0_35] : memref<8x2xf32, #tpu.memory_space<vmem>>, vector<8x2xf32>
    tpu.vector_store %arg3[%c0_34, %c0_35], %55 {strides = array<i32>} : memref<8x2xf32, #tpu.memory_space<vmem>>, vector<8x2xf32>,
    return
  }
  func.func @transform_0(%arg0: i32) -> (i32, i32) {
    %c0_i32 = arith.constant 0 : i32
    %c0_i32_0 = arith.constant 0 : i32
    return %arg0, %c0_i32 : i32, i32
  }
  func.func @transform_1(%arg0: i32) -> (i32, i32, i32) {
    %c0_i32 = arith.constant 0 : i32
    %c0_i32_0 = arith.constant 0 : i32
    %c0_i32_1 = arith.constant 0 : i32
    %c0_i32_2 = arith.constant 0 : i32
    return %c0_i32, %c0_i32_0, %c0_i32_1 : i32, i32, i32
  }
  func.func @transform_2(%arg0: i32) -> (i32, i32) {
    %c0_i32 = arith.constant 0 : i32
    %c0_i32_0 = arith.constant 0 : i32
    return %arg0, %c0_i32 : i32, i32
  }
}

</mosaic_0001>

<bundles_post_ra>
// kernel: tpu_custom_call.1
= control target key start
LH: loop header
LB: loop body
LE: loop exit
PB: predicated region body
PF: predicated region fallthrough
CT: control target
= control target key end

     0   :  { %7 = vsyncpa [#allocation3], 0  ;;  %s242_s12 = smov [#allocation2]   ;;  %s243_s14 = smov 128   ;;  %s273_s0 = inlined_call_operand.vmem [shape: f32[8,4], index: 0, kind: input, shape index: {}]   ;;  %s274_s1 = inlined_call_operand.hbm [shape: f32[10,16,16], index: 1, kind: input, shape index: {}]   ;;  %s275_s2 = inlined_call_operand.vmem [shape: f32[8,2], index: 2, kind: output, shape index: {}]  }
   0x1   :  { %s14_s11 = sshll.u32 %s274_s1, 4  ;;  %s16_s13 = sshll.u32 %s242_s12, 4  ;;  %s15_s11 = int_to_ptr.hbm [resolvable:$true] %s14_s11  ;;  %s17_s13 = int_to_ptr.vmem [resolvable:$true] %s16_s13 }
   0x2   :  { %s244_s15 = smov 8  }
   0x3   :  { %22 = dma.hbm_to_vmem [thread:$0]  %s15_s11, 2560, %s17_s13, [#allocation3], %s243_s14, %s243_s14, %s244_s15  }
   0x4   :  { %240 = dma.done.wait [#allocation3], 2560  }
   0x5   :  { %241 = vsyncadd [#allocation3], 4294964736  ;;  %vm56_vm0 = vcmask 1043456   ;;  %vm52_vm1 = vcmask 31744   ;;  %v28_v0 = vld [vmem:[#allocation2] sm:$0xf] }
   0x6   :  { %v27_v1 = vld [vmem:[%s273_s0] sm:$0xff]  ;;  %198 = vmatpush.msk.msra.mxu0 %vm56_vm0, %v28_v0  ;;  %v31_v2 = vld [vmem:[#allocation2 + $0x18] sm:$0xff]  ;;  %v30_v3 = vld [vmem:[#allocation2 + $0x10] sm:$0xff]  ;;  %vm82_vm2 = vcmask 130048   ;;  %vm181_vm3 = vcmask 15360  }
   0x7   :  { %199 = vmatmul.msk.f32.vlgmr.msra.gmra.mxu0 %vm52_vm1, %v27_v1  ;;  %100 = vmatpush.msra.mxu1 %v31_v2  ;;  %v207_v4 = vld [vmem:[#allocation2 + $0x50] ss:$0 sm:$0xff]  ;;  %v34_v8 = vld [vmem:[#allocation2 + $0x28] sm:$0xff]  ;;  %v33_v9 = vld [vmem:[#allocation2 + $0x20] sm:$0xff] }
   0x8   :  { %125 = vmatpush.msra.mxu2 %v34_v8  ;;  %v208_v10 = vld [vmem:[#allocation2 + $0x60] ss:$0 sm:$0xff]  ;;  %v37_v14 = vld [vmem:[#allocation2 + $0x38] sm:$0xff]  ;;  %v36_v15 = vld [vmem:[#allocation2 + $0x30] sm:$0xff] }
   0x9   :  { %101 = vmatpush.msra.mxu1 %v30_v3  ;;  %150 = vmatpush.msra.mxu3 %v37_v14  ;;  %v40_v16 = vld [vmem:[#allocation2 + $0x48] sm:$0xff]  ;;  %v209_v17 = vld [vmem:[#allocation2 + $0x70] ss:$0 sm:$0xff]  ;;  %v39_v21 = vld [vmem:[#allocation2 + $0x40] sm:$0xff] }
   0xa   :  { %126 = vmatpush.msra.mxu2 %v33_v9  ;;  %175 = vmatpush.msrb.mxu0 %v40_v16  ;;  %v210_v22 = vld [vmem:[#allocation2 + $0x80] ss:$0 sm:$0xff]  ;;  %v211_v26 = vld [vmem:[#allocation2 + $0x90] ss:$0 sm:$0xff] }
   0xb   :  { %151 = vmatpush.msra.mxu3 %v36_v15 }
   0xc   :  { %176 = vmatpush.msrb.mxu0 %v39_v21 }
  0x84   :  { %v77_v5 = vpop.f32.mrf.mxu0 }
  0x85   :  { %v78_v6 = vadd.f32 %v207_v4, %v77_v5 }
  0x87   :  { %v80_v7 = vmax.f32 %v78_v6, 0.0 }
  0x89   :  { %200 = vmatmul.msk.f32.vlgmr.msra.gmra.mxu1 %vm82_vm2, %v80_v7 }
 0x106   :  { %v103_v11 = vpop.f32.mrf.mxu1 }
 0x107   :  { %v104_v12 = vadd.f32 %v208_v10, %v103_v11 }
 0x109   :  { %v106_v13 = vmax.f32 %v104_v12, 0.0 }
 0x10b   :  { %201 = vmatmul.msk.f32.vlgmr.msra.gmra.mxu2 %vm82_vm2, %v106_v13 }
 0x18e   :  { %v128_v18 = vpop.f32.mrf.mxu2 }
 0x18f   :  { %v129_v19 = vadd.f32 %v209_v17, %v128_v18 }
 0x191   :  { %v131_v20 = vmax.f32 %v129_v19, 0.0 }
 0x193   :  { %202 = vmatmul.msk.f32.vlgmr.msra.gmra.mxu3 %vm82_vm2, %v131_v20 }
 0x216   :  { %v153_v23 = vpop.f32.mrf.mxu3 }
 0x217   :  { %v154_v24 = vadd.f32 %v210_v22, %v153_v23 }
 0x219   :  { %v156_v25 = vmax.f32 %v154_v24, 0.0 }
 0x21b   :  { %203 = vmatmul.msk.f32.vlgmr.msrb.gmra.mxu0 %vm82_vm2, %v156_v25 }
 0x298   :  { %v178_v27 = vpop.f32.mrf.mxu0 }
 0x299   :  { %v179_v28 = vadd.f32 %v211_v26, %v178_v27 }
 0x29b   :  { %v182_v29 = vsel %vm181_vm3, %v179_v28, 0.0  ;;  %v185_v30 = vmul.f32 2.0, %v179_v28 }
 0x29c   :  { %183 = vadd.xlane.f32.xlu0 %v182_v29 }
 0x30f   :  { %v184_v31 = vpop.xlane.xlu0 %183 }
 0x310   :  { %v186_v32 = vsub.f32 %v185_v30, %v184_v31 }
 0x312   :  { %v187_v33 = vsub.f32 0.0, %v186_v32 }
 0x314   :  { %v188_v34 = vmul.f32 1.442695, %v187_v33 }
 0x316   :  { %212 = vpow2.f32 %v188_v34 }
 0x31c   :  { %v213_v35 = vpop.eup %212 }
 0x31d   :  { %v190_v36 = vadd.f32 1.0, %v213_v35 }
 0x31f   :  { %214 = vrcp.f32 %v190_v36 }
 0x325   :  { %v215_v37 = vpop.eup %214 }
 0x326   :  { %192 = vst.msk [vmem:[%s275_s2] sm:$0xff] %vm181_vm3, %v215_v37 }
 0x327   :  { %197 = vsyncpa [#allocation3], 1 }

</bundles_post_ra>
